<compile_context>
chip_gen: v7x
topology: tpu7x:2x2x1
jax: 0.10.0
libtpu: 0.0.40
codegen_flags: <defaults>
</compile_context>

<pallas_src>
import jax
import jax.numpy as jnp
from jax.experimental import pallas as pl
from jax.experimental.pallas import tpu as pltpu


# --------------------------------------------------------------------------- #
# Kernel
# --------------------------------------------------------------------------- #
def _se_kernel(x_ref, m_ref, w1_ref, w2_ref, o_ref):
    # x_ref : (Bt, C, HW)
    # m_ref : (Bt, HW)  or  (Bt, 1, HW)
    # w1_ref: (C, Cr)      w2_ref: (Cr, C)
    # o_ref : (Bt, C, HW)
    f32 = jnp.float32
    hi = jax.lax.Precision.HIGHEST

    m = m_ref[...].astype(f32)
    if m.ndim == 2:                       # dense 2-D mask layout
        m = m[:, None, :]                 # (Bt, 1, HW)

    # n = mask.sum((2,3)); n.masked_fill_(n == 0, 1)
    n = jnp.sum(m, axis=-1)               # (Bt, 1)
    n = jnp.where(n == 0.0, 1.0, n)

    # Masked global-average pool, exact in f32 on the VPU/XLU
    # (avoids multi-pass f32 MXU emulation on v5e/v6e).
    y = jnp.sum(x_ref[...].astype(f32) * m, axis=-1) / n        # (Bt, C)

    # fc1 (no bias) + ReLU, fc2 (no bias) + Sigmoid: plain 2-D MXU matmuls.
    h = jnp.maximum(
        jnp.dot(y, w1_ref[...].astype(f32),
                preferred_element_type=f32, precision=hi), 0.0)  # (Bt, Cr)
    s = jax.nn.sigmoid(
        jnp.dot(h, w2_ref[...].astype(f32),
                preferred_element_type=f32, precision=hi))       # (Bt, C)

    # Excite: re-read x from VMEM (short live ranges; lets Mosaic stream the
    # block twice instead of keeping one huge SSA value alive).
    o_ref[...] = (x_ref[...].astype(f32) * s[:, :, None]).astype(o_ref.dtype)


# --------------------------------------------------------------------------- #
# Generation-aware sizing helpers
# --------------------------------------------------------------------------- #
def _vmem_capacity_bytes():
    try:
        return int(pltpu.get_tpu_info().vmem_capacity_bytes)
    except Exception:
        return 64 * 1024 * 1024            # conservative (v7x per-TC)


def _is_dual_tensorcore_chip():
    # Only v7x-style parts split a "parallel" grid across 2 TensorCores in a
    # way that benefits from an even grid count.  Heuristic on device_kind.
    try:
        kind = jax.devices()[0].device_kind.lower()
    except Exception:
        return False
    return ("v7" in kind) or ("7x" in kind)


def _pick_block_batch(B, C, Cr, HW, itemsize, vmem_limit_bytes, two_cores):
    """Largest divisor of B whose double-buffered blocks (+ f32 temps) fit."""
    def rup(v, m):
        return -(-v // m) * m

    sub = max(8, 32 // itemsize)           # sublane quantum: 8 f32 / 16 bf16
    lane_hw = rup(HW, 128)
    row_bytes = rup(C, sub) * lane_hw * itemsize        # one batch row of x/out
    f32_row = rup(C, 8) * lane_hw * 4                   # in-kernel f32 temps
    w_bytes = (rup(C, sub) * rup(Cr, 128) +
               rup(Cr, sub) * rup(C, 128)) * itemsize

    def mask2d_ok(bt):
        return bt == B or bt % sub == 0

    def cost(bt):
        x_blk = bt * row_bytes
        if mask2d_ok(bt):
            m_blk = rup(bt, sub) * lane_hw * itemsize    # dense (Bt, HW) block
        else:
            m_blk = bt * sub * lane_hw * itemsize        # (Bt, 1, HW) block
        # 2x: double-buffered pipeline buffers for every input/output;
        # + ~2 f32 x-blocks of headroom for in-kernel temporaries.
        return 2 * (2 * x_blk + m_blk + w_bytes) + 2 * bt * f32_row

    budget = vmem_limit_bytes - (4 << 20)   # margin for compiler scratch
    divisors = [d for d in range(1, B + 1) if B % d == 0]
    fits = [d for d in divisors if cost(d) <= budget]

    if not fits:
        # TODO(synk): if even a single batch row overflows VMEM (huge C*HW,
        # esp. on v7x's 64 MiB), switch to a two-pass reduce-then-scale kernel
        # tiled over HW instead of over batch.
        bt = 1
    elif two_cores:
        even = [d for d in fits if (B // d) % 2 == 0]
        bt = max(even) if even else max(fits)
    else:
        bt = max(fits)
    return bt, mask2d_ok(bt)


# --------------------------------------------------------------------------- #
# Wrapper
# --------------------------------------------------------------------------- #
def squeeze_and_excitation_2d(x, mask, w1, w2):
    """x: (B, C, H, W), mask: (B, 1, H, W), w1: (C, C//r), w2: (C//r, C).

    w1/w2 correspond to fc[0].weight.T and fc[2].weight.T of the torch module
    (both Linear layers are bias-free).
    """
    B, C, H, W = x.shape
    HW = H * W
    Cr = w1.shape[1]
    itemsize = jnp.dtype(x.dtype).itemsize

    vmem_cap = _vmem_capacity_bytes()
    vmem_limit = max(min(3 * vmem_cap // 4, 100 * 1024 * 1024), 32 * 1024 * 1024)
    two_cores = _is_dual_tensorcore_chip()

    Bt, mask_2d = _pick_block_batch(B, C, Cr, HW, itemsize, vmem_limit, two_cores)
    nB = B // Bt

    # Free layout plumbing only: collapse spatial dims, no padding, no copies.
    x2 = x.reshape(B, C, HW)
    if mask_2d:
        m2 = mask.reshape(B, HW).astype(x.dtype)
        m_spec = pl.BlockSpec((Bt, HW), lambda b: (b, 0))
    else:
        m2 = mask.reshape(B, 1, HW).astype(x.dtype)
        m_spec = pl.BlockSpec((Bt, 1, HW), lambda b: (b, 0, 0))

    out = pl.pallas_call(
        _se_kernel,
        out_shape=jax.ShapeDtypeStruct((B, C, HW), x.dtype),
        grid=(nB,),
        in_specs=[
            pl.BlockSpec((Bt, C, HW), lambda b: (b, 0, 0)),
            m_spec,
            pl.BlockSpec((C, Cr), lambda b: (0, 0)),
            pl.BlockSpec((Cr, C), lambda b: (0, 0)),
        ],
        out_specs=pl.BlockSpec((Bt, C, HW), lambda b: (b, 0, 0)),
        compiler_params=pltpu.CompilerParams(
            dimension_semantics=("parallel",),
            vmem_limit_bytes=vmem_limit,
        ),
    )(x2, m2, w1, w2)

    return out.reshape(B, C, H, W)


# --------------------------------------------------------------------------- #
# Reference & self-test
# --------------------------------------------------------------------------- #
def _reference(x, mask, w1, w2):
    hi = jax.lax.Precision.HIGHEST
    n = mask.sum(axis=(2, 3))
    n = jnp.where(n == 0.0, 1.0, n)
    y = (x * mask).sum(axis=(2, 3)) / n                      # (B, C)
    h = jnp.maximum(jnp.dot(y, w1, precision=hi), 0.0)
    s = jax.nn.sigmoid(jnp.dot(h, w2, precision=hi))         # (B, C)
    return x * s[:, :, None, None]


if __name__ == "__main__":
    # Module config: channel >= reduction so channel // reduction > 0.
    B, C, H, W = 2, 64, 16, 16
    reduction = 16
    Cr = C // reduction                                      # 4

    key = jax.random.PRNGKey(0)
    kx, km, k1, k2 = jax.random.split(key, 4)

    x = jax.random.normal(kx, (B, C, H, W), dtype=jnp.float32)
    # Binary validity mask (B, 1, H, W), like the particle mask in ParticleNeXt.
    mask = (jax.random.uniform(km, (B, 1, H, W)) > 0.3).astype(jnp.float32)

    # Deterministic synthetic weights for the two bias-free Linear layers.
    w1 = jax.random.normal(k1, (C, Cr), dtype=jnp.float32) * (1.0 / jnp.sqrt(C))
    w2 = jax.random.normal(k2, (Cr, C), dtype=jnp.float32) * (1.0 / jnp.sqrt(Cr))

    out = squeeze_and_excitation_2d(x, mask, w1, w2)
    out = jax.block_until_ready(out)

    ref = _reference(x, mask, w1, w2)
    assert out.shape == (B, C, H, W)
    assert jnp.allclose(out, ref, atol=1e-4, rtol=1e-4), "mismatch vs reference"

    print("KERNEL_OK")
</pallas_src>

<mosaic_0001>
module attributes {stable_mosaic.version = 11 : i64} {
  func.func @_se_kernel(%arg0: i32, %arg1: memref<2x64x256xf32, #tpu.memory_space<vmem>>, %arg2: memref<2x256xf32, #tpu.memory_space<vmem>>, %arg3: memref<64x4xf32, #tpu.memory_space<vmem>>, %arg4: memref<4x64xf32, #tpu.memory_space<vmem>>, %arg5: memref<2x64x256xf32, #tpu.memory_space<vmem>>) attributes {dimension_semantics = [#tpu.dimension_semantics<parallel>], iteration_bounds = array<i64: 1>, scalar_prefetch = 0 : i64, scratch_operands = 0 : i64, tpu.core_type = #tpu.core_type<tc>, window_params = [{transform_indices = @transform_0, window_bounds = array<i64: 2, 64, 256>}, {transform_indices = @transform_1, window_bounds = array<i64: 2, 256>}, {pipeline_mode = #tpu.pipeline_mode<synchronous>, transform_indices = @transform_2, window_bounds = array<i64: 64, 4>}, {pipeline_mode = #tpu.pipeline_mode<synchronous>, transform_indices = @transform_3, window_bounds = array<i64: 4, 64>}, {transform_indices = @transform_4, window_bounds = array<i64: 2, 64, 256>}]} {
    %c0 = arith.constant 0 : index
    %c0_0 = arith.constant 0 : index
    %0 = vector.load %arg2[%c0, %c0_0] : memref<2x256xf32, #tpu.memory_space<vmem>>, vector<2x256xf32>
    %1 = vector.shape_cast %0 : vector<2x256xf32> to vector<2x1x256xf32>
    %cst = arith.constant dense<0.000000e+00> : vector<2x1xf32>
    %2 = vector.multi_reduction <add>, %1, %cst [2] : vector<2x1x256xf32> to vector<2x1xf32>
    %cst_1 = arith.constant 0.000000e+00 : f32
    %3 = vector.broadcast %cst_1 : f32 to vector<2x1xf32>
    %4 = arith.cmpf oeq, %2, %3 : vector<2x1xf32>
    %cst_2 = arith.constant 1.000000e+00 : f32
    %5 = vector.broadcast %cst_2 : f32 to vector<2x1xf32>
    %6 = arith.select %4, %5, %2 : vector<2x1xi1>, vector<2x1xf32>
    %c0_3 = arith.constant 0 : index
    %c0_4 = arith.constant 0 : index
    %c0_5 = arith.constant 0 : index
    %7 = vector.load %arg1[%c0_3, %c0_4, %c0_5] : memref<2x64x256xf32, #tpu.memory_space<vmem>>, vector<2x64x256xf32>
    %8 = vector.broadcast %1 : vector<2x1x256xf32> to vector<2x64x256xf32>
    %9 = arith.mulf %7, %8 : vector<2x64x256xf32>
    %cst_6 = arith.constant dense<0.000000e+00> : vector<2x64xf32>
    %10 = vector.multi_reduction <add>, %9, %cst_6 [2] : vector<2x64x256xf32> to vector<2x64xf32>
    %11 = vector.broadcast %6 : vector<2x1xf32> to vector<2x64xf32>
    %12 = arith.divf %10, %11 : vector<2x64xf32>
    %c0_7 = arith.constant 0 : index
    %c0_8 = arith.constant 0 : index
    %13 = vector.load %arg3[%c0_7, %c0_8] : memref<64x4xf32, #tpu.memory_space<vmem>>, vector<64x4xf32>
    %cst_9 = arith.constant dense<0.000000e+00> : vector<2x4xf32>
    %14 = tpu.matmul %12, %13, %cst_9 {dimension_numbers = #tpu.dot_dimension_numbers<[1], [0], [0], [1], [0, 0, 1, 1], [], []>, precision = #tpu.contract_precision<fp32>} : vector<2x64xf32>, vector<64x4xf32>, vector<2x4xf32> -> vector<2x4xf32>
    %cst_10 = arith.constant 0.000000e+00 : f32
    %15 = vector.broadcast %cst_10 : f32 to vector<2x4xf32>
    %16 = arith.maximumf %14, %15 : vector<2x4xf32>
    %c0_11 = arith.constant 0 : index
    %c0_12 = arith.constant 0 : index
    %17 = vector.load %arg4[%c0_11, %c0_12] : memref<4x64xf32, #tpu.memory_space<vmem>>, vector<4x64xf32>
    %cst_13 = arith.constant dense<0.000000e+00> : vector<2x64xf32>
    %18 = tpu.matmul %16, %17, %cst_13 {dimension_numbers = #tpu.dot_dimension_numbers<[1], [0], [0], [1], [0, 0, 1, 1], [], []>, precision = #tpu.contract_precision<fp32>} : vector<2x4xf32>, vector<4x64xf32>, vector<2x64xf32> -> vector<2x64xf32>
    %19 = arith.negf %18 : vector<2x64xf32>
    %20 = math.exp %19 : vector<2x64xf32>
    %cst_14 = arith.constant 1.000000e+00 : f32
    %21 = vector.broadcast %cst_14 : f32 to vector<2x64xf32>
    %22 = arith.addf %21, %20 : vector<2x64xf32>
    %23 = arith.divf %21, %22 : vector<2x64xf32>
    %c0_15 = arith.constant 0 : index
    %c0_16 = arith.constant 0 : index
    %c0_17 = arith.constant 0 : index
    %24 = vector.load %arg1[%c0_15, %c0_16, %c0_17] : memref<2x64x256xf32, #tpu.memory_space<vmem>>, vector<2x64x256xf32>
    %25 = vector.shape_cast %23 : vector<2x64xf32> to vector<2x64x1xf32>
    %26 = vector.broadcast %25 : vector<2x64x1xf32> to vector<2x64x256xf32>
    %27 = arith.mulf %24, %26 : vector<2x64x256xf32>
    %c0_18 = arith.constant 0 : index
    %c0_19 = arith.constant 0 : index
    %c0_20 = arith.constant 0 : index
    %28 = vector.load %arg5[%c0_18, %c0_19, %c0_20] : memref<2x64x256xf32, #tpu.memory_space<vmem>>, vector<2x64x256xf32>
    tpu.vector_store %arg5[%c0_18, %c0_19, %c0_20], %27 {strides = array<i32>} : memref<2x64x256xf32, #tpu.memory_space<vmem>>, vector<2x64x256xf32>,
    return
  }
  func.func @transform_0(%arg0: i32) -> (i32, i32, i32) {
    %c0_i32 = arith.constant 0 : i32
    %c0_i32_0 = arith.constant 0 : i32
    %c0_i32_1 = arith.constant 0 : i32
    return %arg0, %c0_i32, %c0_i32_0 : i32, i32, i32
  }
  func.func @transform_1(%arg0: i32) -> (i32, i32) {
    %c0_i32 = arith.constant 0 : i32
    %c0_i32_0 = arith.constant 0 : i32
    return %arg0, %c0_i32 : i32, i32
  }
  func.func @transform_2(%arg0: i32) -> (i32, i32) {
    %c0_i32 = arith.constant 0 : i32
    %c0_i32_0 = arith.constant 0 : i32
    %c0_i32_1 = arith.constant 0 : i32
    return %c0_i32, %c0_i32_0 : i32, i32
  }
  func.func @transform_3(%arg0: i32) -> (i32, i32) {
    %c0_i32 = arith.constant 0 : i32
    %c0_i32_0 = arith.constant 0 : i32
    %c0_i32_1 = arith.constant 0 : i32
    return %c0_i32, %c0_i32_0 : i32, i32
  }
  func.func @transform_4(%arg0: i32) -> (i32, i32, i32) {
    %c0_i32 = arith.constant 0 : i32
    %c0_i32_0 = arith.constant 0 : i32
    %c0_i32_1 = arith.constant 0 : i32
    return %arg0, %c0_i32, %c0_i32_0 : i32, i32, i32
  }
}

</mosaic_0001>

<bundles_post_ra>
// kernel: tpu_custom_call.1
= control target key start
LH: loop header
LB: loop body
LE: loop exit
PB: predicated region body
PF: predicated region fallthrough
CT: control target
= control target key end

     0   :  { %9 = vsyncpa [#allocation3], 0  ;;  %s2308_s0 = inlined_call_operand.hbm [shape: f32[2,64,256], index: 0, kind: input, shape index: {}]   ;;  %s2309_s1 = inlined_call_operand.vmem [shape: f32[2,256], index: 1, kind: input, shape index: {}]   ;;  %s2310_s2 = inlined_call_operand.vmem [shape: f32[64,4], index: 2, kind: input, shape index: {}]   ;;  %s2311_s3 = inlined_call_operand.vmem [shape: f32[4,64], index: 3, kind: input, shape index: {}]   ;;  %s2312_s4 = inlined_call_operand.hbm [shape: f32[2,64,256], index: 4, kind: output, shape index: {}]  }
   0x1   :  { %10 = vsyncpa [#allocation4], 0  ;;  %s1854_s15 = smov [#allocation2]   ;;  %s1806_s19 = scalar_lea.hbm %s2308_s0, 4096 }
   0x2   :  { %s16_s16 = sshll.u32 %s1854_s15, 4  ;;  %p1807_p0 = scmp.ne.s32.totalorder %s2308_s0, %s1806_s19  ;;  %s17_s16 = int_to_ptr.vmem [resolvable:$true] %s16_s16 }
   0x3   :  { %p1810_p1 = scmp.lt.u32.totalorder %s1806_s19, %s2308_s0 }
   0x5   :  { %p1812_p2 = pnand %p1810_p1, %p1807_p0 }
   0x7   :  { %1815 = shalt.err (!%p1812_p2)
}
   0x8   :  { %s1816_s24 = scalar_lea.vmem %s17_s16, 4096  ;;  %p1821_p4 = scmp.lt.s32.totalorder %s17_s16, %s17_s16 }
   0x9   :  { %p1817_p3 = scmp.ne.s32.totalorder %s17_s16, %s1816_s24  ;;  %p1822_p5 = scmp.lt.s32.totalorder %s1816_s24, %s1816_s24 }
   0xb   :  { %p1823_p6 = por %p1822_p5, %p1821_p4 }
   0xd   :  { %p1824_p7 = pnand %p1823_p6, %p1817_p3 }
   0xf   :  { %1827 = shalt.err (!%p1824_p7)
}
  0x10   :  { %s1855_s25 = smov 256   ;;  %s1856_s26 = smov 16  }
  0x11   :  { %22 = dma.hbm_to_vmem [thread:$0]  %s2308_s0, 4096, %s17_s16, [#allocation3], %s1855_s25, %s1855_s25, %s1856_s26  }
  0x12   :  { %1850 = dma.done.wait [#allocation3], 4096  }
  0x13   :  { %1851 = vsyncadd [#allocation3], 4294963200  ;;  %v42_v0 = vlaneseq  ;;  %vm62_vm0 = vcmask 1040384   ;;  %v1913_v5 = vld [vmem:[#allocation2] sm:$0xff]  ;;  %v1915_v6 = vld [vmem:[#allocation2 + $0x8] sm:$0xff]  ;;  %vm1858_vm1 = vmmov 0  }
  0x14   :  { %v1488_v4 = vld.sshfl [vmem:[%s2309_s1] sm:$0x33 pattern:$0x75316420]  ;;  %v1925_v10 = vld [vmem:[#allocation2 + $0x28] sm:$0xff]  ;;  %v1927_v11 = vld [vmem:[#allocation2 + $0x10] sm:$0xff] }
  0x15   :  { %v1902_v1 = vshrl.u32 %v42_v0, 7  ;;  %v1923_v9 = vld [vmem:[#allocation2 + $0x20] sm:$0xff]  ;;  %v41_v12 = vcombine.high %v1488_v4, %v1488_v4  ;;  %v1929_v13 = vld [vmem:[#allocation2 + $0x18] sm:$0xff]  ;;  %v1945_v22 = vld [vmem:[#allocation2 + $0x90] sm:$0xff]  ;;  %vm250_vm4 = vcmask 130112   ;;  %vm257_vm5 = vcmask 195712  }
  0x16   :  { %2331 = vst [vmem:[#allocation8_spill] sm:$0xff] %v1945_v22  ;;  %v1955_v27 = vld [vmem:[#allocation2 + $0x98] sm:$0xff]  ;;  %v1963_v33 = vld [vmem:[#allocation2 + $0x30] sm:$0xff]  ;;  %v1969_v36 = vld [vmem:[#allocation2 + $0xa0] sm:$0xff]  ;;  %vm264_vm6 = vcmask 261312   ;;  %vm271_vm7 = vcmask 326912  }
  0x17   :  { %v1905_v2 = vsub.s32 0, %v1902_v1  ;;  %v1908_v3 = vsub.s32 1, %v1902_v1  ;;  %2332 = vst [vmem:[#allocation9_spill] sm:$0xff] %v1955_v27  ;;  %v1965_v34 = vld [vmem:[#allocation2 + $0x38] sm:$0xff]  ;;  %2333 = vst [vmem:[#allocation10_spill] sm:$0xff] %v1969_v36  ;;  %v1971_v37 = vld [vmem:[#allocation2 + $0xa8] sm:$0xff] }
  0x18   :  { %2334 = vst [vmem:[#allocation11_spill] sm:$0xff] %v1971_v37  ;;  %v1981_v44 = vld [vmem:[#allocation2 + $0x80] sm:$0xff]  ;;  %v1983_v45 = vld [vmem:[#allocation2 + $0x88] sm:$0xff]  ;;  %v1985_v46 = vld [vmem:[#allocation2 + $0xb0] sm:$0xff]  ;;  %vm278_vm8 = vcmask 392512   ;;  %vm285_vm9 = vcmask 458112  }
  0x19   :  { %v1918_v7 = vrot.slane %v1488_v4, %v1905_v2  ;;  %v1921_v8 = vrot.slane %v1488_v4, %v1908_v3  ;;  %v1950_v25 = vrot.slane %v41_v12, %v1905_v2  ;;  %v1953_v26 = vrot.slane %v41_v12, %v1908_v3  ;;  %2335 = vst [vmem:[#allocation12_spill] sm:$0xff] %v1985_v46  ;;  %v1987_v47 = vld [vmem:[#allocation2 + $0xb8] sm:$0xff]  ;;  %v1997_v54 = vld [vmem:[#allocation2 + $0x40] sm:$0xff]  ;;  %v1999_v55 = vld [vmem:[#allocation2 + $0x48] sm:$0xff] }
  0x1a   :  { %2336 = vst [vmem:[#allocation13_spill] sm:$0xff] %v1987_v47  ;;  %v2001_v56 = vld [vmem:[#allocation2 + $0xc0] sm:$0xff]  ;;  %v2003_v57 = vld [vmem:[#allocation2 + $0xc8] sm:$0xff]  ;;  %v2013_v4 = vld [vmem:[#allocation2 + $0x50] sm:$0xff]  ;;  %vm292_vm10 = vcmask 523712   ;;  %vm333_vm11 = vcmask 1041409  }
  0x1b   :  { %v63_v14 = vsel %vm62_vm0, %v1918_v7, 0.0  ;;  %v64_v15 = vsel %vm62_vm0, %v1921_v8, 0.0  ;;  %v109_v16 = vmul.f32 %v1913_v5, %v1918_v7  ;;  %v110_v17 = vmul.f32 %v1915_v6, %v1921_v8  ;;  %2337 = vst [vmem:[#allocation14_spill] sm:$0xff] %v2001_v56  ;;  %2338 = vst [vmem:[#allocation15_spill] sm:$0xff] %v2003_v57  ;;  %v2015_v12 = vld [vmem:[#allocation2 + $0x58] sm:$0xff] }
  0x1c   :  { %v65_v18 = vadd.f32 %v64_v15, %v63_v14  ;;  %v113_v19 = vmul.f32 %v1923_v9, %v1918_v7  ;;  %v114_v20 = vmul.f32 %v1925_v10, %v1921_v8  ;;  %v111_v21 = vmul.f32 %v1927_v11, %v1918_v7  ;;  %v2017_v14 = vld [vmem:[#allocation2 + $0xd0] sm:$0xff]  ;;  %v2019_v15 = vld [vmem:[#allocation2 + $0xd8] sm:$0xff] }
  0x1d   :  { %v141_v23 = vadd.f32 %v110_v17, %v109_v16  ;;  %v112_v24 = vmul.f32 %v1929_v13, %v1921_v8  ;;  %v68_v30 = vsel %vm62_vm0, %v1950_v25, 0.0  ;;  %v69_v31 = vsel %vm62_vm0, %v1953_v26, 0.0  ;;  %2339 = vst [vmem:[#allocation16_spill] sm:$0xff] %v2017_v14  ;;  %2340 = vst [vmem:[#allocation17_spill] sm:$0xff] %v2019_v15 }
  0x1e   :  { %66 = vadd.xlane.f32.xlu0 %v65_v18  ;;  %v147_v28 = vadd.f32 %v114_v20, %v113_v19  ;;  %v127_v32 = vmul.f32 %v1945_v22, %v1950_v25  ;;  %v128_v35 = vmul.f32 %v1955_v27, %v1953_v26  ;;  %v70_v38 = vadd.f32 %v69_v31, %v68_v30 }
  0x1f   :  { %142 = vadd.xlane.f32.xlu1 %v141_v23  ;;  %v144_v29 = vadd.f32 %v112_v24, %v111_v21  ;;  %v115_v39 = vmul.f32 %v1963_v33, %v1918_v7  ;;  %v116_v40 = vmul.f32 %v1965_v34, %v1921_v8  ;;  %v129_v42 = vmul.f32 %v1969_v36, %v1950_v25  ;;  %v2029_v23 = vld [vmem:[#allocation2 + $0x60] sm:$0xff]  ;;  %v2031_v24 = vld [vmem:[#allocation2 + $0x68] sm:$0xff] }
  0x20   :  { %v168_v41 = vadd.f32 %v128_v35, %v127_v32  ;;  %v130_v43 = vmul.f32 %v1971_v37, %v1953_v26  ;;  %v125_v49 = vmul.f32 %v1981_v44, %v1950_v25  ;;  %v126_v50 = vmul.f32 %v1983_v45, %v1953_v26 }
  0x21   :  { %v150_v48 = vadd.f32 %v116_v40, %v115_v39  ;;  %v131_v52 = vmul.f32 %v1985_v46, %v1950_v25  ;;  %v132_v53 = vmul.f32 %v1987_v47, %v1953_v26  ;;  %v117_v59 = vmul.f32 %v1997_v54, %v1918_v7 }
  0x22   :  { %148 = vadd.xlane.f32.xlu0 %v147_v28  ;;  %v171_v51 = vadd.f32 %v130_v43, %v129_v42  ;;  %v165_v58 = vadd.f32 %v126_v50, %v125_v49  ;;  %v118_v60 = vmul.f32 %v1999_v55, %v1921_v8  ;;  %v133_v62 = vmul.f32 %v2001_v56, %v1950_v25  ;;  %v2033_v28 = vld [vmem:[#allocation2 + $0xe0] sm:$0xff]  ;;  %v2051_v42 = vld [vmem:[#allocation2 + $0x78] sm:$0xff]  ;;  %v2053_v43 = vld [vmem:[#allocation2 + $0xf0] sm:$0xff] }
  0x23   :  { %145 = vadd.xlane.f32.xlu1 %v144_v29  ;;  %v174_v61 = vadd.f32 %v132_v53, %v131_v52  ;;  %v134_v63 = vmul.f32 %v2003_v57, %v1953_v26  ;;  %v119_v17 = vmul.f32 %v2013_v4, %v1918_v7  ;;  %v120_v18 = vmul.f32 %v2015_v12, %v1921_v8  ;;  %v2035_v29 = vld [vmem:[#allocation2 + $0xe8] sm:$0xff] }
  0x24   :  { %v153_v16 = vadd.f32 %v118_v60, %v117_v59  ;;  %v135_v20 = vmul.f32 %v2017_v14, %v1950_v25  ;;  %v136_v21 = vmul.f32 %v2019_v15, %v1953_v26  ;;  %2341 = vst [vmem:[#allocation18_spill] sm:$0xff] %v2033_v28  ;;  %2342 = vst [vmem:[#allocation19_spill] sm:$0xff] %v2035_v29  ;;  %v240_v30 = vand.u32 127, %v42_v0  ;;  %v2049_v0 = vld [vmem:[#allocation2 + $0x70] sm:$0xff] }
  0x25   :  { %v177_v19 = vadd.f32 %v134_v63, %v133_v62  ;;  %v156_v31 = vadd.f32 %v120_v18, %v119_v17  ;;  %v121_v32 = vmul.f32 %v2029_v23, %v1918_v7  ;;  %v122_v35 = vmul.f32 %v2031_v24, %v1921_v8  ;;  %2343 = vst [vmem:[#allocation20_spill] sm:$0xff] %v2053_v43  ;;  %v215_v17 = vld [vmem:[%s2310_s2] sm:$0xff]  ;;  %v216_v18 = vld [vmem:[%s2310_s2 + $0x8] sm:$0xff] }
  0x26   :  { %71 = vadd.xlane.f32.xlu0 %v70_v38  ;;  %v2043_v38 = vsub.s32 %v240_v30, %v1902_v1  ;;  %v180_v39 = vadd.f32 %v136_v21, %v135_v20  ;;  %v137_v40 = vmul.f32 %v2033_v28, %v1950_v25  ;;  %v123_v50 = vmul.f32 %v2049_v0, %v1918_v7 }
  0x27   :  { %169 = vadd.xlane.f32.xlu1 %v168_v41  ;;  %v138_v41 = vmul.f32 %v2035_v29, %v1953_v26  ;;  %v159_v49 = vadd.f32 %v122_v35, %v121_v32  ;;  %v139_v53 = vmul.f32 %v2053_v43, %v1950_v25  ;;  %v252_v59 = vadd.s32 4294967280, %v240_v30 }
  0x28   :  { %v245_v60 = vadd.s32 4294967288, %v240_v30  ;;  %v266_v25 = vadd.s32 4294967264, %v240_v30  ;;  %v339_v20 = vand.u32 4294901760, %v215_v17  ;;  %v342_v21 = vand.u32 4294901760, %v216_v18 }
  0x29   :  { %v183_v52 = vadd.f32 %v138_v41, %v137_v40  ;;  %v2066_v7 = vsub.s32 %v252_v59, %v1902_v1  ;;  %v218_v40 = vld [vmem:[%s2310_s2 + $0x18] sm:$0xff]  ;;  %v280_v41 = vadd.s32 4294967248, %v240_v30  ;;  %vm335_vm12 = vcmask 523264  }
  0x2a   :  { %151 = vadd.xlane.f32.xlu0 %v150_v48  ;;  %v2055_v48 = vld [vmem:[#allocation2 + $0xf8] sm:$0xff]  ;;  %v2086_v32 = vsub.f32 %v215_v17, %v339_v20  ;;  %v2088_v35 = vsub.f32 %v216_v18, %v342_v21  ;;  %vm881_vm13 = vcmask 1043456   ;;  %vm877_vm14 = vcmask 31744  }
  0x2b   :  { %172 = vadd.xlane.f32.xlu1 %v171_v51  ;;  %2344 = vst [vmem:[#allocation21_spill] sm:$0xff] %v2055_v48  ;;  %v124_v51 = vmul.f32 %v2051_v42, %v1921_v8  ;;  %v2069_v8 = vsub.s32 %v245_v60, %v1902_v1  ;;  %v219_v60 = vld [vmem:[%s2310_s2 + $0x20] sm:$0xff] }
  0x2d   :  { %v162_v62 = vadd.f32 %v124_v51, %v123_v50  ;;  %v2325_v51 = vmov 0.0|0.0  }
  0x2e   :  { %166 = vadd.xlane.f32.xlu0 %v165_v58  ;;  %v140_v58 = vmul.f32 %v2055_v48, %v1953_v26  ;;  %v2075_v26 = vsub.s32 %v266_v25, %v1902_v1  ;;  %1724 = vmatprep.subr.bf16.mxu0 %v2325_v51  ;;  %v2315_v48 = vmov 0.0  }
  0x2f   :  { %175 = vadd.xlane.f32.xlu1 %v174_v61  ;;  %v259_v61 = vadd.s32 4294967272, %v240_v30  ;;  %1700 = vmatprep.subr.bf16.mxu1 %v2325_v51 }
  0x30   :  { %v186_v63 = vadd.f32 %v140_v58, %v139_v53  ;;  %v2101_v53 = vsub.s32 %v280_v41, %v1902_v1  ;;  %v221_v41 = vld [vmem:[%s2310_s2 + $0x30] sm:$0xff]  ;;  %1610 = vmatprep.mubr.msk.f32.mxu0 %vm1858_vm1, %v2315_v48  ;;  %1572 = vmatprep.mubr.msk.f32.mxu1 %vm1858_vm1, %v2315_v48 }
  0x32   :  { %154 = vadd.xlane.f32.xlu0 %v153_v16  ;;  %v2072_v16 = vsub.s32 %v259_v61, %v1902_v1  ;;  %v220_v61 = vld [vmem:[%s2310_s2 + $0x28] sm:$0xff] }
  0x33   :  { %178 = vadd.xlane.f32.xlu1 %v177_v19  ;;  %v273_v19 = vadd.s32 4294967256, %v240_v30  ;;  %v354_v25 = vand.u32 4294901760, %v220_v61 }
  0x36   :  { %157 = vadd.xlane.f32.xlu0 %v156_v31  ;;  %v2084_v31 = vsub.s32 %v273_v19, %v1902_v1  ;;  %v2119_v19 = vpack.c.bf16 %v342_v21, %v339_v20 }
  0x37   :  { %181 = vadd.xlane.f32.xlu1 %v180_v39  ;;  %v217_v39 = vld [vmem:[%s2310_s2 + $0x10] sm:$0xff] }
  0x38   :  { %v345_v50 = vand.u32 4294901760, %v217_v39  ;;  %1702 = vmatpush3.bf16.msra.mxu1 %v2119_v19 }
  0x39   :  { %1703 = vmatprep.subr.bf16.mxu1 %v2325_v51 }
  0x3a   :  { %160 = vadd.xlane.f32.xlu0 %v159_v49  ;;  %v1725_v49 = vpack.c.bf16 %v2088_v35, %v2086_v32  ;;  %v2103_v58 = vsub.f32 %v217_v39, %v345_v50 }
  0x3b   :  { %184 = vadd.xlane.f32.xlu1 %v183_v52  ;;  %v348_v52 = vand.u32 4294901760, %v218_v40 }
  0x3c   :  { %1726 = vmatpush3.bf16.msra.mxu0 %v1725_v49  ;;  %v357_v49 = vand.u32 4294901760, %v221_v41  ;;  %v438_v43 = vand.u32 4294901760, %v2103_v58 }
  0x3d   :  { %1727 = vmatprep.subr.bf16.mxu0 %v2325_v51  ;;  %v2106_v59 = vsub.f32 %v218_v40, %v348_v52  ;;  %v458_v40 = vsub.f32 %v220_v61, %v354_v25  ;;  %v2130_v20 = vpack.c.bf16 %v348_v52, %v345_v50  ;;  %v424_v50 = vand.u32 4294901760, %v2086_v32 }
  0x3e   :  { %163 = vadd.xlane.f32.xlu0 %v162_v62  ;;  %v287_v62 = vadd.s32 4294967240, %v240_v30  ;;  %v222_v30 = vld [vmem:[%s2310_s2 + $0x38] sm:$0xff]  ;;  %v465_v21 = vsub.f32 %v221_v41, %v357_v49  ;;  %v431_v52 = vand.u32 4294901760, %v2088_v35  ;;  %v439_v15 = vsub.f32 %v2103_v58, %v438_v43 }
  0x3f   :  { %187 = vadd.xlane.f32.xlu1 %v186_v63  ;;  %v351_v63 = vand.u32 4294901760, %v219_v60  ;;  %v1728_v17 = vpack.c.bf16 %v2106_v59, %v2103_v58  ;;  %1705 = vmatpush3.bf16.msra.mxu1 %v2130_v20 }
  0x40   :  { %v2117_v18 = vsub.s32 %v287_v62, %v1902_v1  ;;  %v360_v1 = vand.u32 4294901760, %v222_v30  ;;  %1706 = vmatprep.subr.bf16.mxu1 %v2325_v51  ;;  %v432_v41 = vsub.f32 %v2088_v35, %v431_v52  ;;  %v459_v35 = vand.u32 4294901760, %v458_v40 }
  0x41   :  { %v451_v39 = vsub.f32 %v219_v60, %v351_v63  ;;  %1729 = vmatpush3.bf16.msra.mxu0 %v1728_v17  ;;  %v2134_v17 = vpack.c.bf16 %v354_v25, %v351_v63  ;;  %v425_v25 = vsub.f32 %v2086_v32, %v424_v50  ;;  %v466_v46 = vand.u32 4294901760, %v465_v21 }
  0x42   :  { %1730 = vmatprep.subr.bf16.mxu0 %v2325_v51  ;;  %v472_v60 = vsub.f32 %v222_v30, %v360_v1  ;;  %v2146_v63 = vpack.c.bf16 %v360_v1, %v357_v49  ;;  %v440_v1 = vand.u32 4294901760, %v439_v15 }
  0x43   :  { %v1731_v62 = vpack.c.bf16 %v458_v40, %v451_v39  ;;  %1708 = vmatpush3.bf16.msra.mxu1 %v2134_v17  ;;  %v426_v30 = vand.u32 4294901760, %v425_v25  ;;  %v452_v14 = vand.u32 4294901760, %v451_v39 }
  0x44   :  { %v1734_v61 = vpack.c.bf16 %v472_v60, %v465_v21  ;;  %1709 = vmatprep.subr.bf16.mxu1 %v2325_v51  ;;  %v473_v57 = vand.u32 4294901760, %v472_v60 }
  0x45   :  { %1732 = vmatpush3.bf16.msra.mxu0 %v1731_v62  ;;  %v433_v62 = vand.u32 4294901760, %v432_v41  ;;  %v453_v25 = vsub.f32 %v451_v39, %v452_v14  ;;  %v460_v41 = vsub.f32 %v458_v40, %v459_v35 }
  0x46   :  { %1733 = vmatprep.subr.bf16.mxu0 %v2325_v51  ;;  %v2170_v39 = vpack.c.bf16 %v473_v57, %v466_v46 }
  0x47   :  { %1711 = vmatpush3.bf16.msra.mxu1 %v2146_v63  ;;  %v2154_v48 = vpack.c.bf16 %v433_v62, %v426_v30  ;;  %v454_v28 = vand.u32 4294901760, %v453_v25  ;;  %v461_v47 = vand.u32 4294901760, %v460_v41  ;;  %v467_v30 = vsub.f32 %v465_v21, %v466_v46 }
  0x48   :  { %1712 = vmatprep.subr.bf16.mxu1 %v2325_v51  ;;  %v474_v62 = vsub.f32 %v472_v60, %v473_v57 }
  0x49   :  { %1735 = vmatpush3.bf16.msra.mxu0 %v1734_v61  ;;  %v445_v61 = vand.u32 4294901760, %v2106_v59  ;;  %v2160_v56 = vpack.c.bf16 %v461_v47, %v454_v28  ;;  %v468_v58 = vand.u32 4294901760, %v467_v30 }
  0x4a   :  { %1736 = vmatprep.subr.bf16.mxu0 %v2325_v51  ;;  %v2162_v51 = vpack.c.bf16 %v431_v52, %v424_v50 }
  0x4b   :  { %v446_v49 = vsub.f32 %v2106_v59, %v445_v61  ;;  %v475_v59 = vand.u32 4294901760, %v474_v62 }
  0x4d   :  { %v447_v32 = vand.u32 4294901760, %v446_v49  ;;  %v2164_v15 = vpack.c.bf16 %v475_v59, %v468_v58  ;;  %v2166_v49 = vpack.c.bf16 %v445_v61, %v438_v43 }
  0x4f   :  { %v2158_v29 = vpack.c.bf16 %v447_v32, %v440_v1  ;;  %v2168_v1 = vpack.c.bf16 %v459_v35, %v452_v14 }
  0xab   :  { %v67_v40 = vpop.xlane.xlu0 %66 }
  0xac   :  { %vm73_vm2 = vcmp.eq.f32.partialorder %v67_v40, 0.0  ;;  %v143_v32 = vpop.xlane.xlu1 %142 }
  0xad   :  { %v75_v25 = vsel %vm73_vm2, 1.0, %v67_v40 }
  0xae   :  { %v192_v47 = vrot.slane %v75_v25, %v1905_v2 }
  0xaf   :  { %v149_v28 = vpop.xlane.xlu0 %148 }
  0xb0   :  { %1798 = vrcp.f32 %v192_v47  ;;  %v146_v21 = vpop.xlane.xlu1 %145 }
  0xb3   :  { %v72_v60 = vpop.xlane.xlu0 %71 }
  0xb4   :  { %vm74_vm3 = vcmp.eq.f32.partialorder %v72_v60, 0.0  ;;  %v170_v50 = vpop.xlane.xlu1 %169 }
  0xb5   :  { %v76_v52 = vsel %vm74_vm3, 1.0, %v72_v60 }
  0xb6   :  { %v196_v43 = vrot.slane %v76_v52, %v1905_v2 }
  0xb7   :  { %v152_v61 = vpop.xlane.xlu0 %151 }
  0xb8   :  { %1800 = vrcp.f32 %v196_v43  ;;  %v173_v14 = vpop.xlane.xlu1 %172 }
  0xba   :  { %v1799_v46 = vpop.eup %1798 }
  0xbb   :  { %v198_v57 = vmul.f32 %v1799_v46, %v143_v32  ;;  %v200_v35 = vmul.f32 %v1799_v46, %v149_v28  ;;  %v199_v41 = vmul.f32 %v1799_v46, %v146_v21  ;;  %v201_v30 = vmul.f32 %v1799_v46, %v152_v61  ;;  %v167_v62 = vpop.xlane.xlu0 %166 }
  0xbc   :  { %v176_v58 = vpop.xlane.xlu1 %175 }
  0xbd   :  { %v244_v59 = vrot.slane %v198_v57, %v2043_v38  ;;  %v256_v40 = vrot.slane %v200_v35, %v2066_v7  ;;  %v249_v25 = vrot.slane %v199_v41, %v2069_v8  ;;  %v263_v60 = vrot.slane %v201_v30, %v2072_v16 }
  0xbf   :  { %v251_v47 = vsel %vm250_vm4, %v249_v25, %v244_v59  ;;  %v155_v52 = vpop.xlane.xlu0 %154 }
  0xc0   :  { %v258_v32 = vsel %vm257_vm5, %v256_v40, %v251_v47  ;;  %v202_v28 = vmul.f32 %v1799_v46, %v155_v52  ;;  %v179_v21 = vpop.xlane.xlu1 %178 }
  0xc1   :  { %v265_v43 = vsel %vm264_vm6, %v263_v60, %v258_v32 }
  0xc2   :  { %v1801_v61 = vpop.eup %1800  ;;  %v270_v57 = vrot.slane %v202_v28, %v2075_v26 }
  0xc3   :  { %v208_v35 = vmul.f32 %v1801_v61, %v170_v50  ;;  %v209_v27 = vmul.f32 %v1801_v61, %v173_v14  ;;  %v207_v41 = vmul.f32 %v1801_v61, %v167_v62  ;;  %v210_v22 = vmul.f32 %v1801_v61, %v176_v58  ;;  %v158_v37 = vpop.xlane.xlu0 %157 }
  0xc4   :  { %v272_v59 = vsel %vm271_vm7, %v270_v57, %v265_v43  ;;  %v211_v25 = vmul.f32 %v1801_v61, %v179_v21  ;;  %v203_v30 = vmul.f32 %v1799_v46, %v158_v37  ;;  %v182_v36 = vpop.xlane.xlu1 %181 }
  0xc5   :  { %v301_v40 = vrot.slane %v208_v35, %v2069_v8  ;;  %v306_v47 = vrot.slane %v209_v27, %v2066_v7  ;;  %v297_v60 = vrot.slane %v207_v41, %v2043_v38  ;;  %v212_v32 = vmul.f32 %v1801_v61, %v182_v36 }
  0xc6   :  { %v277_v52 = vrot.slane %v203_v30, %v2084_v31  ;;  %v311_v14 = vrot.slane %v210_v22, %v2072_v16  ;;  %v316_v37 = vrot.slane %v211_v25, %v2075_v26 }
  0xc7   :  { %v302_v50 = vsel %vm250_vm4, %v301_v40, %v297_v60  ;;  %v161_v62 = vpop.xlane.xlu0 %160  ;;  %v321_v38 = vrot.slane %v212_v32, %v2084_v31 }
  0xc8   :  { %v307_v58 = vsel %vm257_vm5, %v306_v47, %v302_v50  ;;  %v279_v28 = vsel %vm278_vm8, %v277_v52, %v272_v59  ;;  %v204_v8 = vmul.f32 %v1799_v46, %v161_v62  ;;  %v185_v21 = vpop.xlane.xlu1 %184 }
  0xc9   :  { %v312_v27 = vsel %vm264_vm6, %v311_v14, %v307_v58  ;;  %v213_v7 = vmul.f32 %v1801_v61, %v185_v21 }
  0xca   :  { %v317_v36 = vsel %vm271_vm7, %v316_v37, %v312_v27  ;;  %v284_v43 = vrot.slane %v204_v8, %v2101_v53 }
  0xcb   :  { %v322_v22 = vsel %vm278_vm8, %v321_v38, %v317_v36  ;;  %v326_v16 = vrot.slane %v213_v7, %v2101_v53  ;;  %v164_v57 = vpop.xlane.xlu0 %163 }
  0xcc   :  { %v286_v26 = vsel %vm285_vm9, %v284_v43, %v279_v28  ;;  %v205_v35 = vmul.f32 %v1799_v46, %v164_v57  ;;  %v188_v41 = vpop.xlane.xlu1 %187  ;;  %v2345_v46 = vmov 0.0  }
  0xcd   :  { %v327_v59 = vsel %vm285_vm9, %v326_v16, %v322_v22  ;;  %v214_v25 = vmul.f32 %v1801_v61, %v188_v41  ;;  %v2346_v61 = vmov 0.0|0.0  }
  0xce   :  { %v291_v30 = vrot.slane %v205_v35, %v2117_v18 }
  0xcf   :  { %v331_v31 = vrot.slane %v214_v25, %v2117_v18 }
  0xd0   :  { %v293_v40 = vsel %vm292_vm10, %v291_v30, %v286_v26 }
  0xd1   :  { %v332_v47 = vsel %vm292_vm10, %v331_v31, %v327_v59 }
  0xd2   :  { %v334_v60 = vsel %vm333_vm11, %v332_v47, %v293_v40 }
  0xd3   :  { %v336_v52 = vsel %vm335_vm12, %v334_v60, 0 }
  0xd4   :  { %v411_v32 = vand.u32 4294901760, %v336_v52 }
  0xd6   :  { %v412_v50 = vsub.f32 %v336_v52, %v411_v32 }
  0xd8   :  { %1611 = vmatmul.mubr.f32.vlgmr.msra.gmra.mrb[0].mxu0 %v412_v50  ;;  %v413_v53 = vand.u32 4294901760, %v412_v50 }
  0xd9   :  { %1738 = vmatpush3.bf16.msra.mxu0 %v2119_v19  ;;  %1629 = vmatprep.mubr.msk.f32.mxu0 %vm1858_vm1, %v2345_v46 }
  0xda   :  { %1739 = vmatprep.subr.bf16.mxu0 %v2346_v61  ;;  %v414_v14 = vsub.f32 %v412_v50, %v413_v53 }
  0xdc   :  { %v415_v62 = vand.u32 4294901760, %v414_v14 }
  0xdd   :  { %1741 = vmatpush3.bf16.msra.mxu0 %v2130_v20 }
  0xde   :  { %1573 = vmatmul.mubr.f32.vlgmr.msra.gmra.mrb[0].mxu1 %v415_v62  ;;  %1742 = vmatprep.subr.bf16.mxu0 %v2346_v61  ;;  %v2348_v62 = vld [vmem:[#allocation11_spill] sm:$0xff] }
  0xdf   :  { %1714 = vmatpush3.bf16.msra.mxu1 %v2154_v48  ;;  %1591 = vmatprep.mubr.msk.f32.mxu1 %vm1858_vm1, %v2345_v46 }
  0xe0   :  { %1715 = vmatprep.subr.bf16.mxu1 %v2346_v61 }
  0xe1   :  { %1744 = vmatpush3.bf16.msra.mxu0 %v2134_v17 }
  0xe2   :  { %1745 = vmatprep.subr.bf16.mxu0 %v2346_v61 }
  0xe3   :  { %1717 = vmatpush3.bf16.msra.mxu1 %v2158_v29 }
  0xe4   :  { %1718 = vmatprep.subr.bf16.mxu1 %v2346_v61 }
  0xe5   :  { %1747 = vmatpush3.bf16.msra.mxu0 %v2146_v63 }
  0xe6   :  { %1748 = vmatprep.subr.bf16.mxu0 %v2346_v61 }
  0xe7   :  { %1720 = vmatpush3.bf16.msra.mxu1 %v2160_v56  ;;  %v876_v56 = vld [vmem:[%s2311_s3] sm:$0xf]  ;;  %s1860_s3 = smov [#allocation5]  }
  0xe8   :  { %1630 = vmatmul.mubr.f32.vlgmr.msra.gmra.mrb[0].mxu0 %v413_v53  ;;  %1721 = vmatprep.subr.bf16.mxu1 %v2346_v61  ;;  %v883_v29 = vsel %vm881_vm13, %v876_v56, 0  ;;  %s1476_s20 = sshll.u32 %s1860_s3, 4  ;;  %s1477_s20 = int_to_ptr.vmem [resolvable:$true] %s1476_s20 }
  0xe9   :  { %1750 = vmatpush3.bf16.msra.mxu0 %v2162_v51  ;;  %1648 = vmatprep.mubr.msk.f32.mxu0 %vm1858_vm1, %v2345_v46  ;;  %v886_v48 = vand.u32 4294901760, %v883_v29  ;;  %s1828_s21 = scalar_lea.vmem %s1477_s20, 4096  ;;  %p1833_p9 = scmp.lt.s32.totalorder %s1477_s20, %s1477_s20 }
  0xea   :  { %1751 = vmatprep.subr.bf16.mxu0 %v2346_v61  ;;  %p1829_p8 = scmp.ne.s32.totalorder %s1477_s20, %s1828_s21  ;;  %p1834_p10 = scmp.lt.s32.totalorder %s1828_s21, %s1828_s21 }
  0xeb   :  { %1723 = vmatpush3.bf16.msra.mxu1 %v2164_v15  ;;  %v963_v15 = vsub.f32 %v883_v29, %v886_v48  ;;  %v2350_v29 = vld [vmem:[#allocation9_spill] sm:$0xff] }
  0xec   :  { %1670 = vmatprep.subr.mxu1 %v2345_v46  ;;  %p1835_p11 = por %p1834_p10, %p1833_p9 }
  0xed   :  { %1753 = vmatpush3.bf16.msra.mxu0 %v2166_v49 }
  0xee   :  { %1592 = vmatmul.mubr.f32.vlgmr.msra.gmra.mrb[0].mxu1 %v411_v32  ;;  %1754 = vmatprep.subr.bf16.mxu0 %v2346_v61  ;;  %p1836_p12 = pnand %p1835_p11, %p1829_p8 }
  0xef   :  { %1672 = vmatprep.mubr.msk.f32.mxu1 %vm1858_vm1, %v2345_v46  ;;  %1671 = vmatpush3.msra.mxu1 %v886_v48 }
  0xf0   :  { %1675 = vmatprep.subr.mxu1 %v2345_v46 }
  0xf1   :  { %1756 = vmatpush3.bf16.msra.mxu0 %v2168_v1  ;;  %v964_v1 = vand.u32 4294901760, %v963_v15 }
  0xf2   :  { %1757 = vmatprep.subr.bf16.mxu0 %v2346_v61 }
  0xf3   :  { %v965_v37 = vsub.f32 %v963_v15, %v964_v1 }
  0xf5   :  { %1759 = vmatpush3.bf16.msra.mxu0 %v2170_v39  ;;  %v966_v21 = vand.u32 4294901760, %v965_v37 }
  0xf6   :  { %1760 = vmatprep.subr.bf16.mxu0 %v2346_v61 }
  0xf8   :  { %1649 = vmatmul.mubr.f32.vlgmr.msra.gmra.mrb[0].mxu0 %v411_v32 }
  0xf9   :  { %1762 = vmatpush3.bf16.msra.mxu0 %v2119_v19  ;;  %1667 = vmatprep.mubr.msk.f32.mxu0 %vm1858_vm1, %v2345_v46 }
  0xfa   :  { %1763 = vmatprep.subr.bf16.mxu0 %v2346_v61 }
  0xfd   :  { %1765 = vmatpush3.bf16.msra.mxu0 %v2130_v20 }
  0xfe   :  { %1766 = vmatprep.subr.bf16.mxu0 %v2346_v61 }
 0x101   :  { %1768 = vmatpush3.bf16.msra.mxu0 %v2134_v17 }
 0x102   :  { %1769 = vmatprep.subr.bf16.mxu0 %v2346_v61  ;;  %v2347_v61 = vld [vmem:[#allocation10_spill] sm:$0xff] }
 0x105   :  { %1771 = vmatpush3.bf16.msra.mxu0 %v2146_v63 }
 0x108   :  { %1668 = vmatmul.mubr.f32.vlgmr.msra.gmra.mrb[0].mxu0 %v411_v32 }
 0x1c1   :  { %v528_v51 = vpop.f32.mrb[0].mxu1 }
 0x1c2   :  { %v1593_v18 = vpop.f32.mrb[1].mxu1 }
 0x1db   :  { %v871_v19 = vpop.f32.mrb[0].mxu0 }
 0x1dc   :  { %v1772_v20 = vadd.f32 %v871_v19, %v528_v51  ;;  %v1669_v17 = vpop.f32.mrb[1].mxu0  ;;  %v2351_v51 = vld [vmem:[#allocation14_spill] sm:$0xff]  ;;  %v2352_v19 = vld [vmem:[#allocation15_spill] sm:$0xff] }
 0x1dd   :  { %v2353_v17 = vld [vmem:[#allocation12_spill] sm:$0xff] }
 0x1de   :  { %v875_v49 = vmax.f32 %v1772_v20, 0.0 }
 0x1e0   :  { %v879_v63 = vsel %vm877_vm14, %v875_v49, 0  ;;  %v2354_v49 = vld [vmem:[#allocation13_spill] sm:$0xff] }
 0x1e1   :  { %v951_v39 = vand.u32 4294901760, %v879_v63 }
 0x1e3   :  { %v952_v58 = vsub.f32 %v879_v63, %v951_v39 }
 0x1e5   :  { %v953_v28 = vand.u32 4294901760, %v952_v58 }
 0x1e7   :  { %v954_v8 = vsub.f32 %v952_v58, %v953_v28 }
 0x1e9   :  { %v955_v27 = vand.u32 4294901760, %v954_v8  ;;  %v2357_v8 = vld [vmem:[#allocation16_spill] sm:$0xff] }
 0x1eb   :  { %1673 = vmatmul.mubr.f32.vlgmr.msra.gmra.mrb[2].mxu1 %v955_v27  ;;  %v2358_v27 = vld [vmem:[#allocation17_spill] sm:$0xff] }
 0x1ec   :  { %1676 = vmatpush3.msra.mxu1 %v966_v21  ;;  %1677 = vmatprep.mubr.msk.f32.mxu1 %vm1858_vm1, %v2345_v46 }
 0x1ed   :  { %1680 = vmatprep.subr.mxu1 %v2345_v46 }
 0x1f3   :  { %1678 = vmatmul.mubr.f32.vlgmr.msra.gmra.mrb[2].mxu1 %v951_v39 }
 0x1f4   :  { %1681 = vmatpush3.msra.mxu1 %v963_v15  ;;  %1682 = vmatprep.mubr.msk.f32.mxu1 %vm1858_vm1, %v2345_v46 }
 0x1f5   :  { %1685 = vmatprep.subr.mxu1 %v2345_v46 }
 0x1fb   :  { %1683 = vmatmul.mubr.f32.vlgmr.msra.gmra.mrb[2].mxu1 %v952_v58  ;;  %v2356_v58 = vld [vmem:[#allocation19_spill] sm:$0xff] }
 0x1fc   :  { %1686 = vmatpush3.msra.mxu1 %v886_v48  ;;  %1687 = vmatprep.mubr.msk.f32.mxu1 %vm1858_vm1, %v2345_v46 }
 0x1fd   :  { %1690 = vmatprep.subr.mxu1 %v2345_v46 }
 0x203   :  { %1688 = vmatmul.mubr.f32.vlgmr.msra.gmra.mrb[2].mxu1 %v953_v28 }
 0x204   :  { %1691 = vmatpush3.msra.mxu1 %v964_v1  ;;  %1692 = vmatprep.mubr.msk.f32.mxu1 %vm1858_vm1, %v2345_v46  ;;  %v2355_v1 = vld [vmem:[#allocation18_spill] sm:$0xff] }
 0x205   :  { %1695 = vmatprep.subr.mxu1 %v2345_v46 }
 0x20b   :  { %1693 = vmatmul.mubr.f32.vlgmr.msra.gmra.mrb[2].mxu1 %v951_v39 }
 0x20c   :  { %1696 = vmatpush3.msra.mxu1 %v886_v48  ;;  %1697 = vmatprep.mubr.msk.f32.mxu1 %vm1858_vm1, %v2345_v46 }
 0x213   :  { %1698 = vmatmul.mubr.f32.vlgmr.msra.gmra.mrb[2].mxu1 %v951_v39 }
 0x2e6   :  { %v1327_v38 = vpop.f32.mrb[2].mxu1 }
 0x2e7   :  { %v1489_v7 = vmul.f32 -1.442695, %v1327_v38  ;;  %v1699_v36 = vpop.f32.mrb[3].mxu1 }
 0x2e8   :  { %v2359_v36 = vld [vmem:[#allocation20_spill] sm:$0xff] }
 0x2e9   :  { %1802 = vpow2.f32 %v1489_v7 }
 0x2f3   :  { %v1803_v43 = vpop.eup %1802 }
 0x2f4   :  { %v1334_v22 = vadd.f32 1.0, %v1803_v43 }
 0x2f6   :  { %1804 = vrcp.f32 %v1334_v22  ;;  %v2360_v22 = vld [vmem:[#allocation21_spill] sm:$0xff] }
 0x300   :  { %v1805_v16 = vpop.eup %1804 }
 0x301   :  { %v1340_v57 = vrot.slane %v1805_v16, %v1905_v2  ;;  %v1375_v26 = vrot.slane %v1805_v16, %v1908_v3 }
 0x303   :  { %1346 = vbcast.lane.b32.xlu1 %v1340_v57, 264  ;;  %1342 = vbcast.lane.b32.xlu0 %v1340_v57, 256 }
 0x307   :  { %1350 = vbcast.lane.b32.xlu1 %v1340_v57, 272  ;;  %1358 = vbcast.lane.b32.xlu0 %v1340_v57, 288 }
 0x30b   :  { %1354 = vbcast.lane.b32.xlu1 %v1340_v57, 280  ;;  %1366 = vbcast.lane.b32.xlu0 %v1340_v57, 304 }
 0x30f   :  { %1362 = vbcast.lane.b32.xlu1 %v1340_v57, 296  ;;  %1377 = vbcast.lane.b32.xlu0 %v1375_v26, 256 }
 0x313   :  { %1370 = vbcast.lane.b32.xlu1 %v1340_v57, 312  ;;  %1385 = vbcast.lane.b32.xlu0 %v1375_v26, 272 }
 0x317   :  { %1381 = vbcast.lane.b32.xlu1 %v1375_v26, 264  ;;  %1393 = vbcast.lane.b32.xlu0 %v1375_v26, 288 }
 0x31b   :  { %1389 = vbcast.lane.b32.xlu1 %v1375_v26, 280  ;;  %1401 = vbcast.lane.b32.xlu0 %v1375_v26, 304 }
 0x31f   :  { %1397 = vbcast.lane.b32.xlu1 %v1375_v26, 296 }
 0x323   :  { %1405 = vbcast.lane.b32.xlu1 %v1375_v26, 312 }
 0x375   :  { %v1347_v35 = vpop.permute.xlu1 %1346  ;;  %v1343_v2 = vpop.permute.xlu0 %1342 }
 0x376   :  { %v1409_v41 = vmul.f32 %v1347_v35, %v1927_v11  ;;  %v1410_v59 = vmul.f32 %v1347_v35, %v1929_v13  ;;  %v1407_v25 = vmul.f32 %v1343_v2, %v1913_v5  ;;  %v1408_v3 = vmul.f32 %v1343_v2, %v1915_v6 }
 0x378   :  { %1441 = vst [vmem:[#allocation5 + $0x10] sm:$0xff] %v1409_v41  ;;  %1442 = vst [vmem:[#allocation5 + $0x18] sm:$0xff] %v1410_v59 }
 0x379   :  { %1439 = vst [vmem:[#allocation5] sm:$0xff] %v1407_v25  ;;  %1440 = vst [vmem:[#allocation5 + $0x8] sm:$0xff] %v1408_v3  ;;  %v1351_v30 = vpop.permute.xlu1 %1350  ;;  %v1359_v31 = vpop.permute.xlu0 %1358 }
 0x37a   :  { %v1411_v40 = vmul.f32 %v1351_v30, %v1923_v9  ;;  %v1412_v47 = vmul.f32 %v1351_v30, %v1925_v10  ;;  %v1415_v60 = vmul.f32 %v1359_v31, %v1997_v54  ;;  %v1416_v11 = vmul.f32 %v1359_v31, %v1999_v55 }
 0x37c   :  { %1443 = vst [vmem:[#allocation5 + $0x20] sm:$0xff] %v1411_v40  ;;  %1444 = vst [vmem:[#allocation5 + $0x28] sm:$0xff] %v1412_v47 }
 0x37d   :  { %1447 = vst [vmem:[#allocation5 + $0x40] sm:$0xff] %v1415_v60  ;;  %1448 = vst [vmem:[#allocation5 + $0x48] sm:$0xff] %v1416_v11  ;;  %v1355_v5 = vpop.permute.xlu1 %1354  ;;  %v1367_v6 = vpop.permute.xlu0 %1366 }
 0x37e   :  { %v1413_v13 = vmul.f32 %v1355_v5, %v1963_v33  ;;  %v1414_v52 = vmul.f32 %v1355_v5, %v1965_v34  ;;  %v1419_v32 = vmul.f32 %v1367_v6, %v2029_v23  ;;  %v1420_v9 = vmul.f32 %v1367_v6, %v2031_v24 }
 0x380   :  { %1445 = vst [vmem:[#allocation5 + $0x30] sm:$0xff] %v1413_v13  ;;  %1446 = vst [vmem:[#allocation5 + $0x38] sm:$0xff] %v1414_v52 }
 0x381   :  { %1451 = vst [vmem:[#allocation5 + $0x60] sm:$0xff] %v1419_v32  ;;  %1452 = vst [vmem:[#allocation5 + $0x68] sm:$0xff] %v1420_v9  ;;  %v1363_v10 = vpop.permute.xlu1 %1362  ;;  %v1378_v54 = vpop.permute.xlu0 %1377 }
 0x382   :  { %v1417_v55 = vmul.f32 %v1363_v10, %v2013_v4  ;;  %v1418_v50 = vmul.f32 %v1363_v10, %v2015_v12  ;;  %v1423_v53 = vmul.f32 %v1378_v54, %v1981_v44  ;;  %v1424_v33 = vmul.f32 %v1378_v54, %v1983_v45  ;;  %v2349_v12 = vld [vmem:[#allocation8_spill] sm:$0xff] }
 0x384   :  { %1449 = vst [vmem:[#allocation5 + $0x50] sm:$0xff] %v1417_v55  ;;  %1450 = vst [vmem:[#allocation5 + $0x58] sm:$0xff] %v1418_v50 }
 0x385   :  { %1455 = vst [vmem:[#allocation5 + $0x80] sm:$0xff] %v1423_v53  ;;  %1456 = vst [vmem:[#allocation5 + $0x88] sm:$0xff] %v1424_v33  ;;  %v1371_v34 = vpop.permute.xlu1 %1370  ;;  %v1386_v23 = vpop.permute.xlu0 %1385 }
 0x386   :  { %v1421_v24 = vmul.f32 %v1371_v34, %v2049_v0  ;;  %v1422_v46 = vmul.f32 %v1371_v34, %v2051_v42  ;;  %v1427_v14 = vmul.f32 %v1386_v23, %v2347_v61  ;;  %v1428_v4 = vmul.f32 %v1386_v23, %v2348_v62 }
 0x388   :  { %1453 = vst [vmem:[#allocation5 + $0x70] sm:$0xff] %v1421_v24  ;;  %1454 = vst [vmem:[#allocation5 + $0x78] sm:$0xff] %v1422_v46 }
 0x389   :  { %1459 = vst [vmem:[#allocation5 + $0xa0] sm:$0xff] %v1427_v14  ;;  %1460 = vst [vmem:[#allocation5 + $0xa8] sm:$0xff] %v1428_v4  ;;  %v1382_v44 = vpop.permute.xlu1 %1381  ;;  %v1394_v45 = vpop.permute.xlu0 %1393 }
 0x38a   :  { %v1425_v56 = vmul.f32 %v1382_v44, %v2349_v12  ;;  %v1426_v48 = vmul.f32 %v1382_v44, %v2350_v29  ;;  %v1431_v18 = vmul.f32 %v1394_v45, %v2351_v51  ;;  %v1432_v0 = vmul.f32 %v1394_v45, %v2352_v19 }
 0x38c   :  { %1457 = vst [vmem:[#allocation5 + $0x90] sm:$0xff] %v1425_v56  ;;  %1458 = vst [vmem:[#allocation5 + $0x98] sm:$0xff] %v1426_v48 }
 0x38d   :  { %1463 = vst [vmem:[#allocation5 + $0xc0] sm:$0xff] %v1431_v18  ;;  %1464 = vst [vmem:[#allocation5 + $0xc8] sm:$0xff] %v1432_v0  ;;  %v1390_v42 = vpop.permute.xlu1 %1389  ;;  %v1402_v20 = vpop.permute.xlu0 %1401 }
 0x38e   :  { %v1429_v15 = vmul.f32 %v1390_v42, %v2353_v17  ;;  %v1430_v63 = vmul.f32 %v1390_v42, %v2354_v49  ;;  %v1435_v39 = vmul.f32 %v1402_v20, %v2355_v1  ;;  %v1436_v37 = vmul.f32 %v1402_v20, %v2356_v58 }
 0x390   :  { %1461 = vst [vmem:[#allocation5 + $0xb0] sm:$0xff] %v1429_v15  ;;  %1462 = vst [vmem:[#allocation5 + $0xb8] sm:$0xff] %v1430_v63 }
 0x391   :  { %1467 = vst [vmem:[#allocation5 + $0xe0] sm:$0xff] %v1435_v39  ;;  %1468 = vst [vmem:[#allocation5 + $0xe8] sm:$0xff] %v1436_v37  ;;  %v1398_v28 = vpop.permute.xlu1 %1397 }
 0x392   :  { %v1433_v21 = vmul.f32 %v1398_v28, %v2357_v8  ;;  %v1434_v38 = vmul.f32 %v1398_v28, %v2358_v27 }
 0x394   :  { %1465 = vst [vmem:[#allocation5 + $0xd0] sm:$0xff] %v1433_v21  ;;  %1466 = vst [vmem:[#allocation5 + $0xd8] sm:$0xff] %v1434_v38 }
 0x395   :  { %v1406_v7 = vpop.permute.xlu1 %1405 }
 0x396   :  { %v1437_v43 = vmul.f32 %v1406_v7, %v2359_v36  ;;  %v1438_v16 = vmul.f32 %v1406_v7, %v2360_v22 }
 0x398   :  { %1469 = vst [vmem:[#allocation5 + $0xf0] sm:$0xff] %v1437_v43  ;;  %1470 = vst [vmem:[#allocation5 + $0xf8] sm:$0xff] %v1438_v16 }
 0x399   :  { %1839 = shalt.err (!%p1836_p12)
}
 0x39a   :  { %s1840_s24 = scalar_lea.hbm %s2312_s4, 4096 }
 0x39b   :  { %p1841_p13 = scmp.ne.s32.totalorder %s2312_s4, %s1840_s24  ;;  %p1844_p0 = scmp.lt.u32.totalorder %s1840_s24, %s2312_s4 }
 0x39d   :  { %p1846_p1 = pnand %p1844_p0, %p1841_p13 }
 0x39f   :  { %1849 = shalt.err (!%p1846_p1)
}
 0x3a0   :  { %1482 = dma.vmem_to_hbm [thread:$0]  %s1477_s20, 4096, %s2312_s4, [#allocation4], %s1855_s25, %s1855_s25, %s1856_s26  }
 0x3a1   :  { %1852 = dma.done.wait [#allocation4], 4096  }
 0x3a2   :  { %1853 = vsyncadd [#allocation4], 4294963200 }
 0x3a3   :  { %1486 = vsyncpa [#allocation3], 1 }
 0x3a4   :  { %1487 = vsyncpa [#allocation4], 1 }

</bundles_post_ra>
